<compile_context>
chip_gen: v7x
topology: tpu7x:2x2x1
jax: 0.10.0
libtpu: 0.0.40
codegen_flags: <defaults>
</compile_context>

<pallas_src>
import jax
import jax.numpy as jnp
from jax import lax
from jax.experimental import pallas as pl
from jax.experimental.pallas import tpu as pltpu


def _se_kernel(xf_ref, w1_ref, w2_ref, exp_ref, ox_ref, oy_ref):
    # xf_ref : (TB, d)          w1_ref : (hidden, d)   (torch Linear layout)
    # exp_ref: (c, d) 0/1 map   w2_ref : (c, hidden)
    # ox_ref : (TB, d)          oy_ref : (TB, c)
    xf = xf_ref[...]

    # Linear(d -> hidden, bias=False): xf @ w1.T  (contract d against d; both operands lane-dense)
    h = lax.dot_general(
        xf, w1_ref[...],
        dimension_numbers=(((1,), (1,)), ((), ())),
        preferred_element_type=jnp.float32)
    h = jnp.maximum(h, 0.0)

    # Linear(hidden -> c, bias=False): h @ w2.T
    logits = lax.dot_general(
        h, w2_ref[...],
        dimension_numbers=(((1,), (1,)), ((), ())),
        preferred_element_type=jnp.float32)

    y = 1.0 / (1.0 + jnp.exp(-logits))            # (TB, c), f32 sigmoid
    oy_ref[...] = y.astype(oy_ref.dtype)

    # Expand per-channel gains to a lane-dense (TB, d) scale with a tiny constant 0/1 matmul
    # (avoids a narrow-lane 3D broadcast / in-kernel reshape), then scale x in 2D.
    scale = lax.dot_general(
        y, exp_ref[...],
        dimension_numbers=(((1,), (0,)), ((), ())),
        preferred_element_type=jnp.float32)
    ox_ref[...] = (xf.astype(jnp.float32) * scale).astype(ox_ref.dtype)


def _pick_batch_tile(bs):
    # Biggest tile (multiple of 8, <= 256) that divides bs; tiny batches run as one full block.
    for tb in (256, 128, 64, 32, 16, 8):
        if bs % tb == 0:
            return tb
    return bs


def se_block_4_input(x, w1, w2):
    """x: (bs, c, h, w) NCHW.  w1: (hidden, c*h*w), w2: (c, hidden)  (torch Linear layout).
    Returns (x * y, y) with y of shape (bs, c, 1, 1), matching the PyTorch module."""
    bs, c, h, w = x.shape
    d = c * h * w
    hidden = w1.shape[0]
    assert w1.shape == (hidden, d) and w2.shape == (c, hidden)

    xf = x.reshape(bs, d)  # single lane-dense view; same memory order as torch .view(bs, c*h*w)
    # Channel -> flat-index expansion map: expand[ch, j] = 1 iff j // (h*w) == ch.
    expand = jnp.repeat(jnp.eye(c, dtype=jnp.float32), h * w, axis=1)       # (c, d)

    tb = _pick_batch_tile(bs)
    grid = (bs // tb,)

    itemsize = x.dtype.itemsize
    flops = 2 * bs * d * hidden + 2 * bs * hidden * c + 2 * bs * c * d + bs * d
    bytes_accessed = (2 * bs * d * itemsize            # x in + scaled x out
                      + hidden * d * w1.dtype.itemsize
                      + c * hidden * w2.dtype.itemsize
                      + c * d * 4                      # expansion matrix
                      + bs * c * itemsize)             # y out

    ox, oy = pl.pallas_call(
        _se_kernel,
        out_shape=(
            jax.ShapeDtypeStruct((bs, d), x.dtype),
            jax.ShapeDtypeStruct((bs, c), x.dtype),
        ),
        grid_spec=pltpu.PrefetchScalarGridSpec(
            num_scalar_prefetch=0,
            grid=grid,
            in_specs=[
                pl.BlockSpec((tb, d), lambda i: (i, 0)),        # x tile (lane-dense)
                pl.BlockSpec((hidden, d), lambda i: (0, 0)),    # w1, torch layout, resident
                pl.BlockSpec((c, hidden), lambda i: (0, 0)),    # w2, torch layout, resident
                pl.BlockSpec((c, d), lambda i: (0, 0)),         # channel->flat expansion map
            ],
            out_specs=(
                pl.BlockSpec((tb, d), lambda i: (i, 0)),        # scaled x, lane-dense
                pl.BlockSpec((tb, c), lambda i: (i, 0)),        # per-channel gains
            ),
        ),
        compiler_params=pltpu.CompilerParams(
            dimension_semantics=("parallel",),
        ),
        cost_estimate=pl.CostEstimate(
            flops=flops, transcendentals=bs * c, bytes_accessed=bytes_accessed),
    )(xf, w1, w2, expand)

    return ox.reshape(bs, c, h, w), oy.reshape(bs, c, 1, 1)


def se_block_reference(x, w1, w2):
    bs, c, h, w = x.shape
    y = x.reshape(bs, c * h * w)
    y = jnp.maximum(y @ w1.T, 0.0)
    y = jax.nn.sigmoid(y @ w2.T).reshape(bs, c, 1, 1)
    return x * y, y


if __name__ == "__main__":
    # Module hard-codes Linear in_features = c * 8 * 8  =>  h = w = 8. Pick c=4, r=16, bs=2.
    bs, c, h, w = 2, 4, 8, 8
    r = 16
    d = c * h * w                  # 256
    hidden = d // r                # 16

    key = jax.random.PRNGKey(0)
    kx, k1, k2 = jax.random.split(key, 3)
    x = jax.random.normal(kx, (bs, c, h, w), dtype=jnp.float32)
    # deterministic synthetic weights (torch Linear layout: (out_features, in_features))
    w1 = 0.05 * jax.random.normal(k1, (hidden, d), dtype=jnp.float32)
    w2 = 0.05 * jax.random.normal(k2, (c, hidden), dtype=jnp.float32)

    out_x, out_y = jax.jit(se_block_4_input)(x, w1, w2)
    jax.block_until_ready(out_x)
    jax.block_until_ready(out_y)

    ref_x, ref_y = se_block_reference(x, w1, w2)
    assert out_x.shape == (bs, c, h, w) and out_y.shape == (bs, c, 1, 1)
    assert jnp.allclose(out_x, ref_x, atol=1e-5, rtol=1e-5)
    assert jnp.allclose(out_y, ref_y, atol=1e-5, rtol=1e-5)

    print("KERNEL_OK")
</pallas_src>

<mosaic_0001>
module attributes {stable_mosaic.version = 11 : i64} {
  func.func @_se_kernel(%arg0: i32, %arg1: memref<2x256xf32, #tpu.memory_space<vmem>>, %arg2: memref<16x256xf32, #tpu.memory_space<vmem>>, %arg3: memref<4x16xf32, #tpu.memory_space<vmem>>, %arg4: memref<4x256xf32, #tpu.memory_space<vmem>>, %arg5: memref<2x256xf32, #tpu.memory_space<vmem>>, %arg6: memref<2x4xf32, #tpu.memory_space<vmem>>) attributes {dimension_semantics = [#tpu.dimension_semantics<parallel>], iteration_bounds = array<i64: 1>, scalar_prefetch = 0 : i64, scratch_operands = 0 : i64, tpu.core_type = #tpu.core_type<tc>, window_params = [{transform_indices = @transform_0, window_bounds = array<i64: 2, 256>}, {pipeline_mode = #tpu.pipeline_mode<synchronous>, transform_indices = @transform_1, window_bounds = array<i64: 16, 256>}, {pipeline_mode = #tpu.pipeline_mode<synchronous>, transform_indices = @transform_2, window_bounds = array<i64: 4, 16>}, {pipeline_mode = #tpu.pipeline_mode<synchronous>, transform_indices = @transform_3, window_bounds = array<i64: 4, 256>}, {transform_indices = @transform_4, window_bounds = array<i64: 2, 256>}, {transform_indices = @transform_5, window_bounds = array<i64: 2, 4>}]} {
    %c0 = arith.constant 0 : index
    %c0_0 = arith.constant 0 : index
    %0 = vector.load %arg1[%c0, %c0_0] : memref<2x256xf32, #tpu.memory_space<vmem>>, vector<2x256xf32>
    %c0_1 = arith.constant 0 : index
    %c0_2 = arith.constant 0 : index
    %1 = vector.load %arg2[%c0_1, %c0_2] : memref<16x256xf32, #tpu.memory_space<vmem>>, vector<16x256xf32>
    %cst = arith.constant dense<0.000000e+00> : vector<2x16xf32>
    %2 = tpu.matmul %0, %1, %cst {dimension_numbers = #tpu.dot_dimension_numbers<[1], [1], [0], [0], [0, 0, 1, 0], [], []>} : vector<2x256xf32>, vector<16x256xf32>, vector<2x16xf32> -> vector<2x16xf32>
    %cst_3 = arith.constant 0.000000e+00 : f32
    %3 = vector.broadcast %cst_3 : f32 to vector<2x16xf32>
    %4 = arith.maximumf %2, %3 : vector<2x16xf32>
    %c0_4 = arith.constant 0 : index
    %c0_5 = arith.constant 0 : index
    %5 = vector.load %arg3[%c0_4, %c0_5] : memref<4x16xf32, #tpu.memory_space<vmem>>, vector<4x16xf32>
    %cst_6 = arith.constant dense<0.000000e+00> : vector<2x4xf32>
    %6 = tpu.matmul %4, %5, %cst_6 {dimension_numbers = #tpu.dot_dimension_numbers<[1], [1], [0], [0], [0, 0, 1, 0], [], []>} : vector<2x16xf32>, vector<4x16xf32>, vector<2x4xf32> -> vector<2x4xf32>
    %cst_7 = arith.constant 0.000000e+00 : f32
    %7 = vector.broadcast %cst_7 : f32 to vector<2x4xf32>
    %8 = arith.subf %7, %6 : vector<2x4xf32>
    %9 = math.exp %8 : vector<2x4xf32>
    %cst_8 = arith.constant 1.000000e+00 : f32
    %10 = vector.broadcast %cst_8 : f32 to vector<2x4xf32>
    %11 = arith.addf %10, %9 : vector<2x4xf32>
    %cst_9 = arith.constant 1.000000e+00 : f32
    %12 = vector.broadcast %cst_9 : f32 to vector<2x4xf32>
    %13 = arith.divf %12, %11 : vector<2x4xf32>
    %c0_10 = arith.constant 0 : index
    %c0_11 = arith.constant 0 : index
    %14 = vector.load %arg6[%c0_10, %c0_11] : memref<2x4xf32, #tpu.memory_space<vmem>>, vector<2x4xf32>
    tpu.vector_store %arg6[%c0_10, %c0_11], %13 {strides = array<i32>} : memref<2x4xf32, #tpu.memory_space<vmem>>, vector<2x4xf32>,
    %c0_12 = arith.constant 0 : index
    %c0_13 = arith.constant 0 : index
    %15 = vector.load %arg4[%c0_12, %c0_13] : memref<4x256xf32, #tpu.memory_space<vmem>>, vector<4x256xf32>
    %cst_14 = arith.constant dense<0.000000e+00> : vector<2x256xf32>
    %16 = tpu.matmul %13, %15, %cst_14 {dimension_numbers = #tpu.dot_dimension_numbers<[1], [0], [0], [1], [0, 0, 1, 1], [], []>} : vector<2x4xf32>, vector<4x256xf32>, vector<2x256xf32> -> vector<2x256xf32>
    %17 = arith.mulf %0, %16 : vector<2x256xf32>
    %c0_15 = arith.constant 0 : index
    %c0_16 = arith.constant 0 : index
    %18 = vector.load %arg5[%c0_15, %c0_16] : memref<2x256xf32, #tpu.memory_space<vmem>>, vector<2x256xf32>
    tpu.vector_store %arg5[%c0_15, %c0_16], %17 {strides = array<i32>} : memref<2x256xf32, #tpu.memory_space<vmem>>, vector<2x256xf32>,
    return
  }
  func.func @transform_0(%arg0: i32) -> (i32, i32) {
    %c0_i32 = arith.constant 0 : i32
    %c0_i32_0 = arith.constant 0 : i32
    return %arg0, %c0_i32 : i32, i32
  }
  func.func @transform_1(%arg0: i32) -> (i32, i32) {
    %c0_i32 = arith.constant 0 : i32
    %c0_i32_0 = arith.constant 0 : i32
    %c0_i32_1 = arith.constant 0 : i32
    return %c0_i32, %c0_i32_0 : i32, i32
  }
  func.func @transform_2(%arg0: i32) -> (i32, i32) {
    %c0_i32 = arith.constant 0 : i32
    %c0_i32_0 = arith.constant 0 : i32
    %c0_i32_1 = arith.constant 0 : i32
    return %c0_i32, %c0_i32_0 : i32, i32
  }
  func.func @transform_3(%arg0: i32) -> (i32, i32) {
    %c0_i32 = arith.constant 0 : i32
    %c0_i32_0 = arith.constant 0 : i32
    %c0_i32_1 = arith.constant 0 : i32
    return %c0_i32, %c0_i32_0 : i32, i32
  }
  func.func @transform_4(%arg0: i32) -> (i32, i32) {
    %c0_i32 = arith.constant 0 : i32
    %c0_i32_0 = arith.constant 0 : i32
    return %arg0, %c0_i32 : i32, i32
  }
  func.func @transform_5(%arg0: i32) -> (i32, i32) {
    %c0_i32 = arith.constant 0 : i32
    %c0_i32_0 = arith.constant 0 : i32
    return %arg0, %c0_i32 : i32, i32
  }
}

</mosaic_0001>

<bundles_post_ra>
// kernel: se_block_4_input.1
= control target key start
LH: loop header
LB: loop body
LE: loop exit
PB: predicated region body
PF: predicated region fallthrough
CT: control target
= control target key end

     0   :  { %v29_v3 = vlaneseq  ;;  %v356_v6 = vmov 1983009808   ;;  %v357_v8 = vmov 0.0   ;;  %s426_s0 = inlined_call_operand.vmem [shape: f32[2,256], index: 0, kind: input, shape index: {}]   ;;  %s427_s1 = inlined_call_operand.vmem [shape: f32[16,256], index: 1, kind: input, shape index: {}]   ;;  %s428_s2 = inlined_call_operand.vmem [shape: f32[4,16], index: 2, kind: input, shape index: {}]   ;;  %s429_s3 = inlined_call_operand.vmem [shape: f32[4,256], index: 3, kind: input, shape index: {}]   ;;  %s430_s4 = inlined_call_operand.vmem [shape: f32[2,256], index: 4, kind: output, shape index: {0}]   ;;  %s431_s5 = inlined_call_operand.hbm [shape: f32[2,4], index: 5, kind: output, shape index: {1}]  }
   0x1   :  { %v22_v0 = vld [vmem:[%s427_s1 + $0x8] sm:$0xff]  ;;  %v24_v1 = vld [vmem:[%s427_s1 + $0x18] sm:$0xff]  ;;  %v21_v2 = vld [vmem:[%s427_s1] sm:$0xff]  ;;  %v27_v7 = vunpack.c.l.s4 %v356_v6  ;;  %314 = vmatprep.subr.mxu1 %v357_v8 }
   0x2   :  { %v319_v4 = vpack.c.bf16 %v24_v1, %v22_v0  ;;  %v23_v5 = vld [vmem:[%s427_s1 + $0x10] sm:$0xff] }
   0x3   :  { %11 = vsyncpa [#allocation3], 0  ;;  %v321_v9 = vpack.c.bf16 %v23_v5, %v21_v2  ;;  %v30_v10 = vshrl.u32 %v29_v3, 7  ;;  %v28_v11 = vunpack.c.0.s8 %v27_v7  ;;  %v20_v12 = vld [vmem:[%s426_s0] sm:$0xf]  ;;  %vm108_vm0 = vcmask 130048  }
   0x4   :  { %320 = vmatprep.subr.bf16.mxu0 %v319_v4  ;;  %v107_v16 = vld [vmem:[%s428_s2] sm:$0xf]  ;;  %vm358_vm1 = vmmov 0   ;;  %vm200_vm2 = vcmask 1043456   ;;  %vm196_vm3 = vcmask 31744   ;;  %vm191_vm4 = vcmask 25600  }
   0x5   :  { %322 = vmatpush1.bf16.xpose.msra.mxu0 %v321_v9  ;;  %v31_v13 = vsub.s32 %v28_v11, %v30_v10  ;;  %315 = vmatpush3.xpose.msk.msra.mxu1 %vm108_vm0, %v107_v16  ;;  %v193_v20 = vld [vmem:[%s429_s3] sm:$0xff]  ;;  %s359_s2 = smov [#allocation2]  }
   0x6   :  { %316 = vmatprep.mubr.msk.f32.mxu1 %vm358_vm1, %v357_v8  ;;  %v195_v21 = vcombine.high %v193_v20, %v193_v20  ;;  %s297_s30 = sshll.u32 %s359_s2, 4  ;;  %s298_s30 = int_to_ptr.vmem [resolvable:$true] %s297_s30 }
   0x7   :  { %v32_v14 = vrot.slane %v20_v12, %v31_v13  ;;  %s332_s3 = scalar_lea.vmem %s298_s30, 32  ;;  %p337_p1 = scmp.lt.s32.totalorder %s298_s30, %s298_s30 }
   0x8   :  { %309 = vmatprep.subr.msk.mxu1 %vm200_vm2, %v195_v21  ;;  %p333_p0 = scmp.ne.s32.totalorder %s298_s30, %s332_s3  ;;  %p338_p2 = scmp.lt.s32.totalorder %s332_s3, %s332_s3 }
   0x9   :  { %v33_v15 = vcombine.high %v32_v14, %v32_v14 }
   0xa   :  { %p339_p3 = por %p338_p2, %p337_p1 }
   0xb   :  { %100 = vmatprep.mubr.f32.mxu0 %v33_v15 }
   0xc   :  { %101 = vmatmul.mubr.f32.vlgmr.msra.gmra.mrb[0].mxu0 %v32_v14  ;;  %p340_p4 = pnand %p339_p3, %p333_p0 }
  0xdf   :  { %v102_v17 = vpop.f32.mrb[0].mxu0 }
  0xe0   :  { %v106_v18 = vmax.f32 %v102_v17, 0.0  ;;  %v104_v19 = vpop.f32.mrb[1].mxu0 }
  0xe2   :  { %317 = vmatmul.mubr.msk.f32.vlgmr.msra.gmra.mrb[0].mxu1 %vm108_vm0, %v106_v18 }
  0xe3   :  { %269 = vmatprep.mubr.f32.mxu1 %v357_v8  ;;  %310 = vmatpush1.msk.msra.mxu1 %vm200_vm2, %v193_v20 }
 0x1b5   :  { %v181_v22 = vpop.f32.mrb[0].mxu1 }
 0x1b6   :  { %v185_v23 = vsub.f32 0.0, %v181_v22  ;;  %v318_v24 = vpop.f32.mrb[1].mxu1 }
 0x1b8   :  { %v186_v25 = vmul.f32 1.442695, %v185_v23 }
 0x1ba   :  { %328 = vpow2.f32 %v186_v25 }
 0x1c4   :  { %v329_v26 = vpop.eup %328 }
 0x1c5   :  { %v188_v27 = vadd.f32 1.0, %v329_v26 }
 0x1c7   :  { %330 = vrcp.f32 %v188_v27 }
 0x1d1   :  { %v331_v28 = vpop.eup %330 }
 0x1d2   :  { %311 = vmatmul.mubr.msk.f32.vlgmr.msra.gmra.mrb[2].mxu1 %vm196_vm3, %v331_v28  ;;  %192 = vst.msk [vmem:[#allocation2] sm:$0x3] %vm191_vm4, %v331_v28 }
 0x1d3   :  { %343 = shalt.err (!%p340_p4)
}
 0x1d4   :  { %s344_s8 = scalar_lea.hbm %s431_s5, 32 }
 0x1d5   :  { %p345_p5 = scmp.ne.s32.totalorder %s431_s5, %s344_s8  ;;  %p348_p6 = scmp.lt.u32.totalorder %s344_s8, %s431_s5 }
 0x1d7   :  { %p350_p7 = pnand %p348_p6, %p345_p5 }
 0x1d9   :  { %353 = shalt.err (!%p350_p7)
}
 0x1da   :  { %300 = dma.vmem_to_hbm [thread:$0]  %s298_s30, 32, %s431_s5, [#allocation3]  }
 0x2a5   :  { %v271_v29 = vpop.f32.mrb[2].mxu1 }
 0x2a6   :  { %v273_v30 = vpop.f32.mrb[3].mxu1 }
 0x2a7   :  { %v278_v31 = vcombine.low %v271_v29, %v273_v30 }
 0x2a9   :  { %v285_v32 = vrot.slane %v278_v31, %v31_v13 }
 0x2ab   :  { %v287_v33 = vmul.f32 %v285_v32, %v20_v12 }
 0x2ad   :  { %288 = vst [vmem:[%s430_s4] sm:$0xf] %v287_v33 }
 0x2ae   :  { %354 = dma.done.wait [#allocation3], 32  }
 0x2af   :  { %355 = vsyncadd [#allocation3], 4294967264 }
 0x2b0   :  { %306 = vsyncpa [#allocation3], 1 }

</bundles_post_ra>
